<compile_context>
chip_gen: v7x
topology: tpu7x:2x2x1
jax: 0.10.0
libtpu: 0.0.40
codegen_flags: <defaults>
</compile_context>

<pallas_src>
import functools

import jax
import jax.numpy as jnp
from jax.experimental import pallas as pl
from jax.experimental.pallas import tpu as pltpu

INPUT_DIM = 784
N_CLASS = 10

_NEG_BIG = -1e30  # bias for padded class columns -> exp underflows to exactly 0


def _round_up(a, b):
    return ((a + b - 1) // b) * b


def _linear_softmax_kernel(x_ref, w_ref, b_ref, o_ref, *, n_class):
    # x_ref: (bm, D)  w_ref: (D, Cp)  b_ref: (1, Cp)  o_ref: (bm, n_class)
    logits = jnp.dot(x_ref[...], w_ref[...],
                     preferred_element_type=jnp.float32) + b_ref[...]
    # Numerically-stable softmax along the class axis; padded columns have
    # logit ~ -1e30 so they contribute 0 to both the max and the denominator.
    m = jnp.max(logits, axis=-1, keepdims=True)
    e = jnp.exp(logits - m)
    denom = jnp.sum(e, axis=-1, keepdims=True)
    # approx=False keeps the 1e-5 tolerance; kernel is HBM-bound anyway.
    probs = e * pl.reciprocal(denom, approx=False)
    # Store only the real classes: lane-masked vst is hidden under the DMA,
    # and output HBM bytes drop from 512 B/row to 40 B/row.
    o_ref[...] = probs[:, :n_class].astype(o_ref.dtype)


@functools.partial(jax.jit, static_argnames=("block_m",))
def linear_classifier_aum_forward(x, w, b, *, block_m=2048):
    """probs = softmax(x @ w + b, axis=1), computed in a Pallas TPU kernel."""
    n, d = x.shape
    d2, c = w.shape
    assert d == d2 and b.shape == (c,)

    # Lane-dense class dim inside the kernel (multiple of 128).
    c_pad = max(_round_up(c, 128), 128)
    # Row tile: as large as requested, clamped to the (8-aligned) batch.
    # No row padding of x -- Pallas masks the ragged final block.
    bm = min(block_m, _round_up(n, 8))
    grid = (pl.cdiv(n, bm),)

    # Tiny pads (W: ~0.4 MB, b: 512 B); the x array is passed through untouched.
    w_p = jnp.pad(w.astype(jnp.float32), ((0, 0), (0, c_pad - c)))
    b_p = jnp.concatenate(
        [b.astype(jnp.float32),
         jnp.full((c_pad - c,), _NEG_BIG, jnp.float32)]).reshape(1, c_pad)

    cost = pl.CostEstimate(
        flops=2 * n * d * c_pad,
        transcendentals=n * c_pad,
        bytes_accessed=(n * d + d * c_pad + c_pad + n * c) * 4,
    )

    kernel = functools.partial(_linear_softmax_kernel, n_class=c)

    out = pl.pallas_call(
        kernel,
        out_shape=jax.ShapeDtypeStruct((n, c), jnp.float32),
        grid_spec=pltpu.PrefetchScalarGridSpec(
            num_scalar_prefetch=0,
            grid=grid,
            in_specs=[
                pl.BlockSpec((bm, d), lambda i: (i, 0)),      # x row tile
                pl.BlockSpec((d, c_pad), lambda i: (0, 0)),   # full weight (grid-invariant)
                pl.BlockSpec((1, c_pad), lambda i: (0, 0)),   # full bias   (grid-invariant)
            ],
            out_specs=pl.BlockSpec((bm, c), lambda i: (i, 0)),
        ),
        compiler_params=pltpu.CompilerParams(
            dimension_semantics=("parallel",),      # shards row tiles across TCs (v7x)
            vmem_limit_bytes=32 * 1024 * 1024,      # explicit: above v5e's 16 MiB default
        ),
        cost_estimate=cost,
    )(x.astype(jnp.float32), w_p, b_p)

    return out


def init_linear_params(key, input_dim, n_class):
    # Deterministic init mimicking PyTorch nn.Linear default:
    # U(-1/sqrt(in), 1/sqrt(in)) for both weight and bias.
    kw, kb = jax.random.split(key)
    bound = 1.0 / jnp.sqrt(jnp.float32(input_dim))
    w = jax.random.uniform(kw, (input_dim, n_class), jnp.float32,
                           minval=-bound, maxval=bound)
    b = jax.random.uniform(kb, (n_class,), jnp.float32,
                           minval=-bound, maxval=bound)
    return w, b


if __name__ == "__main__":
    key = jax.random.PRNGKey(0)
    k_x, k_p = jax.random.split(key)

    # Small batch of "flattened MNIST-like" inputs in [0, 1] (X / 255 in ref).
    batch = 16
    x = jax.random.uniform(k_x, (batch, INPUT_DIM), jnp.float32)
    w, b = init_linear_params(k_p, INPUT_DIM, N_CLASS)

    probs = jax.block_until_ready(linear_classifier_aum_forward(x, w, b))

    # Sanity check against plain JAX reference.
    ref = jax.nn.softmax(x @ w + b, axis=1)
    assert probs.shape == (batch, N_CLASS)
    assert jnp.allclose(probs, ref, atol=1e-5, rtol=1e-5)
    assert jnp.allclose(jnp.sum(probs, axis=1), 1.0, atol=1e-5)

    # Non-multiple-of-8 batch -> exercises Pallas' masked ragged (only) block.
    x2 = jax.random.uniform(k_x, (37, INPUT_DIM), jnp.float32)
    probs2 = jax.block_until_ready(linear_classifier_aum_forward(x2, w, b))
    ref2 = jax.nn.softmax(x2 @ w + b, axis=1)
    assert probs2.shape == (37, N_CLASS)
    assert jnp.allclose(probs2, ref2, atol=1e-5, rtol=1e-5)

    # Multi-step grid with a ragged final block (tiny block_m keeps test small).
    x3 = jax.random.uniform(k_x, (100, INPUT_DIM), jnp.float32)
    probs3 = jax.block_until_ready(
        linear_classifier_aum_forward(x3, w, b, block_m=64))
    ref3 = jax.nn.softmax(x3 @ w + b, axis=1)
    assert probs3.shape == (100, N_CLASS)
    assert jnp.allclose(probs3, ref3, atol=1e-5, rtol=1e-5)

    # TODO(synk): ROC_curve (argsort/cumsum/flip/diff bookkeeping) is host-side
    # data analysis, not part of the module forward; left in plain JAX/NumPy.
    print("KERNEL_OK")
</pallas_src>

<mosaic_0001>
module attributes {stable_mosaic.version = 11 : i64} {
  func.func @_linear_softmax_kernel(%arg0: i32, %arg1: memref<16x784xf32, #tpu.memory_space<vmem>>, %arg2: memref<784x128xf32, #tpu.memory_space<vmem>>, %arg3: memref<1x128xf32, #tpu.memory_space<vmem>>, %arg4: memref<16x10xf32, #tpu.memory_space<vmem>>) attributes {dimension_semantics = [#tpu.dimension_semantics<parallel>], iteration_bounds = array<i64: 1>, scalar_prefetch = 0 : i64, scratch_operands = 0 : i64, tpu.core_type = #tpu.core_type<tc>, window_params = [{transform_indices = @transform_0, window_bounds = array<i64: 16, 784>}, {pipeline_mode = #tpu.pipeline_mode<synchronous>, transform_indices = @transform_1, window_bounds = array<i64: 784, 128>}, {pipeline_mode = #tpu.pipeline_mode<synchronous>, transform_indices = @transform_2, window_bounds = array<i64: 1, 128>}, {transform_indices = @transform_3, window_bounds = array<i64: 16, 10>}]} {
    %c0 = arith.constant 0 : index
    %c0_0 = arith.constant 0 : index
    %0 = vector.load %arg1[%c0, %c0_0] : memref<16x784xf32, #tpu.memory_space<vmem>>, vector<16x784xf32>
    %c0_1 = arith.constant 0 : index
    %c0_2 = arith.constant 0 : index
    %1 = vector.load %arg2[%c0_1, %c0_2] : memref<784x128xf32, #tpu.memory_space<vmem>>, vector<784x128xf32>
    %cst = arith.constant dense<0.000000e+00> : vector<16x128xf32>
    %2 = tpu.matmul %0, %1, %cst {dimension_numbers = #tpu.dot_dimension_numbers<[1], [0], [0], [1], [0, 0, 1, 1], [], []>} : vector<16x784xf32>, vector<784x128xf32>, vector<16x128xf32> -> vector<16x128xf32>
    %c0_3 = arith.constant 0 : index
    %c0_4 = arith.constant 0 : index
    %3 = vector.load %arg3[%c0_3, %c0_4] : memref<1x128xf32, #tpu.memory_space<vmem>>, vector<1x128xf32>
    %4 = vector.broadcast %3 : vector<1x128xf32> to vector<16x128xf32>
    %5 = arith.addf %2, %4 : vector<16x128xf32>
    %cst_5 = arith.constant dense<0xFF800000> : vector<16xf32>
    %6 = vector.multi_reduction <maximumf>, %5, %cst_5 [1] : vector<16x128xf32> to vector<16xf32>
    %7 = vector.shape_cast %6 : vector<16xf32> to vector<16x1xf32>
    %8 = vector.broadcast %7 : vector<16x1xf32> to vector<16x128xf32>
    %9 = arith.subf %5, %8 : vector<16x128xf32>
    %10 = math.exp %9 : vector<16x128xf32>
    %cst_6 = arith.constant dense<0.000000e+00> : vector<16xf32>
    %11 = vector.multi_reduction <add>, %10, %cst_6 [1] : vector<16x128xf32> to vector<16xf32>
    %12 = vector.shape_cast %11 : vector<16xf32> to vector<16x1xf32>
    %13 = tpu.reciprocal %12 : vector<16x1xf32> -> vector<16x1xf32>
    %14 = vector.broadcast %13 : vector<16x1xf32> to vector<16x128xf32>
    %15 = arith.mulf %10, %14 : vector<16x128xf32>
    %16 = vector.extract_strided_slice %15 {offsets = [0, 0], sizes = [16, 10], strides = [1, 1]} : vector<16x128xf32> to vector<16x10xf32>
    %c0_7 = arith.constant 0 : index
    %c0_8 = arith.constant 0 : index
    %17 = vector.load %arg4[%c0_7, %c0_8] : memref<16x10xf32, #tpu.memory_space<vmem>>, vector<16x10xf32>
    tpu.vector_store %arg4[%c0_7, %c0_8], %16 {strides = array<i32>} : memref<16x10xf32, #tpu.memory_space<vmem>>, vector<16x10xf32>,
    return
  }
  func.func @transform_0(%arg0: i32) -> (i32, i32) {
    %c0_i32 = arith.constant 0 : i32
    %c0_i32_0 = arith.constant 0 : i32
    return %arg0, %c0_i32 : i32, i32
  }
  func.func @transform_1(%arg0: i32) -> (i32, i32) {
    %c0_i32 = arith.constant 0 : i32
    %c0_i32_0 = arith.constant 0 : i32
    %c0_i32_1 = arith.constant 0 : i32
    return %c0_i32, %c0_i32_0 : i32, i32
  }
  func.func @transform_2(%arg0: i32) -> (i32, i32) {
    %c0_i32 = arith.constant 0 : i32
    %c0_i32_0 = arith.constant 0 : i32
    %c0_i32_1 = arith.constant 0 : i32
    return %c0_i32, %c0_i32_0 : i32, i32
  }
  func.func @transform_3(%arg0: i32) -> (i32, i32) {
    %c0_i32 = arith.constant 0 : i32
    %c0_i32_0 = arith.constant 0 : i32
    return %arg0, %c0_i32 : i32, i32
  }
}

</mosaic_0001>

<bundles_post_ra>
// kernel: linear_classifier_aum_forward.1
= control target key start
LH: loop header
LB: loop body
LE: loop exit
PB: predicated region body
PF: predicated region fallthrough
CT: control target
= control target key end

     0   :  { %s1115_s0 = inlined_call_operand.vmem [shape: f32[16,784], index: 0, kind: input, shape index: {}]   ;;  %s1116_s1 = inlined_call_operand.vmem [shape: f32[784,128], index: 1, kind: input, shape index: {}]   ;;  %s1117_s2 = inlined_call_operand.vmem [shape: f32[1,128], index: 2, kind: input, shape index: {}]   ;;  %s1118_s3 = inlined_call_operand.hbm [shape: f32[16,10], index: 3, kind: output, shape index: {}]  }
   0x1   :  { %v45_v0 = vld [vmem:[%s1116_s1 + $0x80] sm:$0xff]  ;;  %v46_v1 = vld [vmem:[%s1116_s1 + $0x88] sm:$0xff]  ;;  %v47_v11 = vld [vmem:[%s1116_s1 + $0x90] sm:$0xff] }
   0x2   :  { %v29_v2 = vld [vmem:[%s1116_s1] sm:$0xff]  ;;  %v606_v3 = vpack.c.bf16 %v46_v1, %v45_v0  ;;  %v30_v4 = vld [vmem:[%s1116_s1 + $0x8] sm:$0xff]  ;;  %v48_v13 = vld [vmem:[%s1116_s1 + $0x98] sm:$0xff] }
   0x3   :  { %v77_v5 = vld [vmem:[%s1116_s1 + $0x180] sm:$0xff]  ;;  %v78_v6 = vld [vmem:[%s1116_s1 + $0x188] sm:$0xff]  ;;  %v608_v7 = vpack.c.bf16 %v30_v4, %v29_v2  ;;  %v31_v14 = vld [vmem:[%s1116_s1 + $0x10] sm:$0xff]  ;;  %v610_v16 = vpack.c.bf16 %v48_v13, %v47_v11 }
   0x4   :  { %v638_v8 = vpack.c.bf16 %v78_v6, %v77_v5  ;;  %v61_v9 = vld [vmem:[%s1116_s1 + $0x100] sm:$0xff]  ;;  %v62_v10 = vld [vmem:[%s1116_s1 + $0x108] sm:$0xff]  ;;  %607 = vmatprep.subr.bf16.mxu0 %v606_v3  ;;  %v32_v15 = vld [vmem:[%s1116_s1 + $0x18] sm:$0xff] }
   0x5   :  { %v640_v12 = vpack.c.bf16 %v62_v10, %v61_v9  ;;  %609 = vmatpush3.bf16.msra.mxu0 %v608_v7  ;;  %v612_v17 = vpack.c.bf16 %v32_v15, %v31_v14  ;;  %v79_v18 = vld [vmem:[%s1116_s1 + $0x190] sm:$0xff]  ;;  %v80_v19 = vld [vmem:[%s1116_s1 + $0x198] sm:$0xff]  ;;  %v49_v23 = vld [vmem:[%s1116_s1 + $0xa0] sm:$0xff] }
   0x6   :  { %639 = vmatprep.subr.bf16.mxu1 %v638_v8  ;;  %v63_v20 = vld [vmem:[%s1116_s1 + $0x110] sm:$0xff]  ;;  %v642_v21 = vpack.c.bf16 %v80_v19, %v79_v18  ;;  %v64_v22 = vld [vmem:[%s1116_s1 + $0x118] sm:$0xff]  ;;  %v50_v24 = vld [vmem:[%s1116_s1 + $0xa8] sm:$0xff]  ;;  %611 = vmatprep.subr.bf16.mxu0 %v610_v16 }
   0x7   :  { %641 = vmatpush3.bf16.msra.mxu1 %v640_v12  ;;  %v644_v25 = vpack.c.bf16 %v64_v22, %v63_v20  ;;  %v614_v26 = vpack.c.bf16 %v50_v24, %v49_v23  ;;  %v33_v27 = vld [vmem:[%s1116_s1 + $0x20] sm:$0xff]  ;;  %v34_v28 = vld [vmem:[%s1116_s1 + $0x28] sm:$0xff]  ;;  %v51_v35 = vld [vmem:[%s1116_s1 + $0xb0] sm:$0xff] }
   0x8   :  { %v81_v29 = vld [vmem:[%s1116_s1 + $0x1a0] sm:$0xff]  ;;  %643 = vmatprep.subr.bf16.mxu1 %v642_v21  ;;  %v82_v30 = vld [vmem:[%s1116_s1 + $0x1a8] sm:$0xff]  ;;  %v616_v33 = vpack.c.bf16 %v34_v28, %v33_v27  ;;  %v52_v36 = vld [vmem:[%s1116_s1 + $0xb8] sm:$0xff] }
   0x9   :  { %v65_v31 = vld [vmem:[%s1116_s1 + $0x120] sm:$0xff]  ;;  %v66_v32 = vld [vmem:[%s1116_s1 + $0x128] sm:$0xff]  ;;  %613 = vmatpush3.bf16.msra.mxu0 %v612_v17  ;;  %v646_v34 = vpack.c.bf16 %v82_v30, %v81_v29  ;;  %v35_v37 = vld [vmem:[%s1116_s1 + $0x30] sm:$0xff]  ;;  %v618_v39 = vpack.c.bf16 %v52_v36, %v51_v35 }
   0xa   :  { %615 = vmatprep.subr.bf16.mxu0 %v614_v26  ;;  %v648_v38 = vpack.c.bf16 %v66_v32, %v65_v31  ;;  %v36_v40 = vld [vmem:[%s1116_s1 + $0x38] sm:$0xff]  ;;  %v83_v41 = vld [vmem:[%s1116_s1 + $0x1b0] sm:$0xff]  ;;  %v53_v46 = vld [vmem:[%s1116_s1 + $0xc0] sm:$0xff] }
   0xb   :  { %645 = vmatpush3.bf16.msra.mxu1 %v644_v25  ;;  %v84_v42 = vld [vmem:[%s1116_s1 + $0x1b8] sm:$0xff]  ;;  %v67_v44 = vld [vmem:[%s1116_s1 + $0x130] sm:$0xff]  ;;  %v54_v47 = vld [vmem:[%s1116_s1 + $0xc8] sm:$0xff]  ;;  %v620_v48 = vpack.c.bf16 %v36_v40, %v35_v37 }
   0xc   :  { %647 = vmatprep.subr.bf16.mxu1 %v646_v34  ;;  %v650_v43 = vpack.c.bf16 %v84_v42, %v83_v41  ;;  %v68_v45 = vld [vmem:[%s1116_s1 + $0x138] sm:$0xff]  ;;  %v85_v49 = vld [vmem:[%s1116_s1 + $0x1c0] sm:$0xff]  ;;  %v86_v50 = vld [vmem:[%s1116_s1 + $0x1c8] sm:$0xff]  ;;  %v622_v52 = vpack.c.bf16 %v54_v47, %v53_v46 }
   0xd   :  { %617 = vmatpush3.bf16.msra.mxu0 %v616_v33  ;;  %v652_v51 = vpack.c.bf16 %v68_v45, %v67_v44  ;;  %v37_v53 = vld [vmem:[%s1116_s1 + $0x40] sm:$0xff]  ;;  %v38_v54 = vld [vmem:[%s1116_s1 + $0x48] sm:$0xff]  ;;  %v654_v56 = vpack.c.bf16 %v86_v50, %v85_v49  ;;  %v55_v58 = vld [vmem:[%s1116_s1 + $0xd0] sm:$0xff] }
   0xe   :  { %619 = vmatprep.subr.bf16.mxu0 %v618_v39  ;;  %v69_v55 = vld [vmem:[%s1116_s1 + $0x140] sm:$0xff]  ;;  %v70_v57 = vld [vmem:[%s1116_s1 + $0x148] sm:$0xff]  ;;  %v56_v59 = vld [vmem:[%s1116_s1 + $0xd8] sm:$0xff]  ;;  %v624_v62 = vpack.c.bf16 %v38_v54, %v37_v53 }
   0xf   :  { %649 = vmatpush3.bf16.msra.mxu1 %v648_v38  ;;  %v87_v60 = vld [vmem:[%s1116_s1 + $0x1d0] sm:$0xff]  ;;  %v88_v61 = vld [vmem:[%s1116_s1 + $0x1d8] sm:$0xff]  ;;  %v656_v63 = vpack.c.bf16 %v70_v57, %v69_v55  ;;  %v626_v0 = vpack.c.bf16 %v56_v59, %v55_v58  ;;  %v57_v6 = vld [vmem:[%s1116_s1 + $0xe0] sm:$0xff] }
  0x10   :  { %651 = vmatprep.subr.bf16.mxu1 %v650_v43  ;;  %v39_v1 = vld [vmem:[%s1116_s1 + $0x50] sm:$0xff]  ;;  %v40_v2 = vld [vmem:[%s1116_s1 + $0x58] sm:$0xff]  ;;  %v658_v4 = vpack.c.bf16 %v88_v61, %v87_v60  ;;  %v58_v7 = vld [vmem:[%s1116_s1 + $0xe8] sm:$0xff] }
  0x11   :  { %621 = vmatpush3.bf16.msra.mxu0 %v620_v48  ;;  %v71_v3 = vld [vmem:[%s1116_s1 + $0x150] sm:$0xff]  ;;  %v72_v5 = vld [vmem:[%s1116_s1 + $0x158] sm:$0xff]  ;;  %v89_v8 = vld [vmem:[%s1116_s1 + $0x1e0] sm:$0xff]  ;;  %v628_v10 = vpack.c.bf16 %v40_v2, %v39_v1  ;;  %v630_v14 = vpack.c.bf16 %v58_v7, %v57_v6 }
  0x12   :  { %623 = vmatprep.subr.bf16.mxu0 %v622_v52  ;;  %v90_v9 = vld [vmem:[%s1116_s1 + $0x1e8] sm:$0xff]  ;;  %v41_v11 = vld [vmem:[%s1116_s1 + $0x60] sm:$0xff]  ;;  %v660_v13 = vpack.c.bf16 %v72_v5, %v71_v3  ;;  %v59_v19 = vld [vmem:[%s1116_s1 + $0xf0] sm:$0xff] }
  0x13   :  { %653 = vmatpush3.bf16.msra.mxu1 %v652_v51  ;;  %v16_v12 = vld [vmem:[%s1115_s0 + $0x8] sm:$0xff]  ;;  %v73_v16 = vld [vmem:[%s1116_s1 + $0x160] sm:$0xff]  ;;  %v662_v18 = vpack.c.bf16 %v90_v9, %v89_v8  ;;  %v60_v20 = vld [vmem:[%s1116_s1 + $0xf8] sm:$0xff] }
  0x14   :  { %655 = vmatprep.subr.bf16.mxu1 %v654_v56  ;;  %v42_v15 = vld [vmem:[%s1116_s1 + $0x68] sm:$0xff]  ;;  %205 = vmatprep.mubr.f32.mxu0 %v16_v12  ;;  %v18_v21 = vld [vmem:[%s1115_s0 + $0x18] sm:$0xff]  ;;  %v91_v22 = vld [vmem:[%s1116_s1 + $0x1f0] sm:$0xff]  ;;  %v634_v26 = vpack.c.bf16 %v60_v20, %v59_v19 }
  0x15   :  { %625 = vmatpush3.bf16.msra.mxu0 %v624_v62  ;;  %v74_v17 = vld [vmem:[%s1116_s1 + $0x168] sm:$0xff]  ;;  %v92_v23 = vld [vmem:[%s1116_s1 + $0x1f8] sm:$0xff]  ;;  %280 = vmatprep.mubr.f32.mxu1 %v18_v21  ;;  %v632_v24 = vpack.c.bf16 %v42_v15, %v41_v11  ;;  %v43_v27 = vld [vmem:[%s1116_s1 + $0x70] sm:$0xff] }
  0x16   :  { %627 = vmatprep.subr.bf16.mxu0 %v626_v0  ;;  %v664_v25 = vpack.c.bf16 %v74_v17, %v73_v16  ;;  %v44_v28 = vld [vmem:[%s1116_s1 + $0x78] sm:$0xff]  ;;  %v75_v29 = vld [vmem:[%s1116_s1 + $0x170] sm:$0xff]  ;;  %v666_v30 = vpack.c.bf16 %v92_v23, %v91_v22  ;;  %v109_v32 = vld [vmem:[%s1116_s1 + $0x280] sm:$0xff] }
  0x17   :  { %657 = vmatpush3.bf16.msra.mxu1 %v656_v63  ;;  %v76_v31 = vld [vmem:[%s1116_s1 + $0x178] sm:$0xff]  ;;  %v110_v33 = vld [vmem:[%s1116_s1 + $0x288] sm:$0xff]  ;;  %v636_v34 = vpack.c.bf16 %v44_v28, %v43_v27  ;;  %v93_v37 = vld [vmem:[%s1116_s1 + $0x200] sm:$0xff] }
  0x18   :  { %659 = vmatprep.subr.bf16.mxu1 %v658_v4  ;;  %v668_v35 = vpack.c.bf16 %v76_v31, %v75_v29  ;;  %v670_v36 = vpack.c.bf16 %v110_v33, %v109_v32  ;;  %v94_v38 = vld [vmem:[%s1116_s1 + $0x208] sm:$0xff]  ;;  %v111_v39 = vld [vmem:[%s1116_s1 + $0x290] sm:$0xff]  ;;  %v112_v40 = vld [vmem:[%s1116_s1 + $0x298] sm:$0xff] }
  0x19   :  { %629 = vmatpush3.bf16.msra.mxu0 %v628_v10  ;;  %v15_v41 = vld [vmem:[%s1115_s0] sm:$0xff]  ;;  %v672_v42 = vpack.c.bf16 %v94_v38, %v93_v37  ;;  %v17_v43 = vld [vmem:[%s1115_s0 + $0x10] sm:$0xff]  ;;  %v674_v45 = vpack.c.bf16 %v112_v40, %v111_v39  ;;  %v96_v47 = vld [vmem:[%s1116_s1 + $0x218] sm:$0xff] }
  0x1a   :  { %631 = vmatprep.subr.bf16.mxu0 %v630_v14  ;;  %v125_v44 = vld [vmem:[%s1116_s1 + $0x300] sm:$0xff]  ;;  %v95_v46 = vld [vmem:[%s1116_s1 + $0x210] sm:$0xff]  ;;  %v126_v48 = vld [vmem:[%s1116_s1 + $0x308] sm:$0xff] }
  0x1b   :  { %661 = vmatpush3.bf16.msra.mxu1 %v660_v13  ;;  %v113_v49 = vld [vmem:[%s1116_s1 + $0x2a0] sm:$0xff]  ;;  %v114_v50 = vld [vmem:[%s1116_s1 + $0x2a8] sm:$0xff]  ;;  %v702_v52 = vpack.c.bf16 %v126_v48, %v125_v44  ;;  %v25_v53 = vld [vmem:[%s1115_s0 + $0x50] sm:$0xff]  ;;  %v676_v54 = vpack.c.bf16 %v96_v47, %v95_v46 }
  0x1c   :  { %663 = vmatprep.subr.bf16.mxu1 %v662_v18  ;;  %v23_v51 = vld [vmem:[%s1115_s0 + $0x40] sm:$0xff]  ;;  %v22_v56 = vld [vmem:[%s1115_s0 + $0x38] sm:$0xff]  ;;  %v678_v57 = vpack.c.bf16 %v114_v50, %v113_v49  ;;  %v98_v58 = vld [vmem:[%s1116_s1 + $0x228] sm:$0xff] }
  0x1d   :  { %633 = vmatpush3.bf16.msra.mxu0 %v632_v24  ;;  %v97_v55 = vld [vmem:[%s1116_s1 + $0x220] sm:$0xff]  ;;  %v24_v59 = vld [vmem:[%s1115_s0 + $0x48] sm:$0xff] }
  0x1e   :  { %635 = vmatprep.subr.bf16.mxu0 %v634_v26 }
  0x1f   :  { %665 = vmatpush3.bf16.msra.mxu1 %v664_v25 }
  0x20   :  { %667 = vmatprep.subr.bf16.mxu1 %v666_v30 }
  0x21   :  { %637 = vmatpush3.bf16.msra.mxu0 %v636_v34 }
  0x22   :  { %671 = vmatprep.subr.bf16.mxu0 %v670_v36 }
  0x23   :  { %669 = vmatpush3.bf16.msra.mxu1 %v668_v35 }
  0x24   :  { %206 = vmatmul.mubr.f32.vlgmr.msra.gmra.mrb[0].mxu0 %v15_v41 }
  0x25   :  { %673 = vmatpush3.bf16.msra.mxu0 %v672_v42  ;;  %210 = vmatprep.mubr.f32.mxu0 %v23_v51 }
  0x26   :  { %281 = vmatmul.mubr.f32.vlgmr.msra.gmra.mrb[0].mxu1 %v17_v43  ;;  %675 = vmatprep.subr.bf16.mxu0 %v674_v45 }
  0x27   :  { %8 = vsyncpa [#allocation3], 0  ;;  %v115_v60 = vld [vmem:[%s1116_s1 + $0x2b0] sm:$0xff]  ;;  %v116_v61 = vld [vmem:[%s1116_s1 + $0x2b8] sm:$0xff]  ;;  %703 = vmatprep.subr.bf16.mxu1 %v702_v52  ;;  %285 = vmatprep.mubr.f32.mxu1 %v25_v53  ;;  %vm134_vm0 = vcmask 130048   ;;  %v680_v0 = vpack.c.bf16 %v98_v58, %v97_v55  ;;  %vm459_vm1 = vcmask 80896  }
  0x28   :  { %v20_v62 = vld [vmem:[%s1115_s0 + $0x28] sm:$0xff]  ;;  %211 = vmatmul.mubr.f32.gmra.mrb[2].mxu0 %v22_v56  ;;  %705 = vmatpush3.bf16.msra.mxu1 %v702_v52  ;;  %v21_v63 = vld [vmem:[%s1115_s0 + $0x30] sm:$0xff]  ;;  %v682_v1 = vpack.c.bf16 %v116_v61, %v115_v60  ;;  %v100_v3 = vld [vmem:[%s1116_s1 + $0x238] sm:$0xff] }
  0x29   :  { %677 = vmatpush3.bf16.msra.mxu0 %v676_v54  ;;  %v99_v2 = vld [vmem:[%s1116_s1 + $0x230] sm:$0xff]  ;;  %355 = vmatprep.mubr.f32.mxu0 %v20_v62  ;;  %v28_v4 = vld [vmem:[%s1115_s0 + $0x68] sm:$0xff]  ;;  %v117_v5 = vld [vmem:[%s1116_s1 + $0x2c0] sm:$0xff] }
  0x2a   :  { %286 = vmatmul.mubr.f32.gmra.mrb[2].mxu1 %v24_v59  ;;  %679 = vmatprep.subr.bf16.mxu0 %v678_v57  ;;  %v118_v6 = vld [vmem:[%s1116_s1 + $0x2c8] sm:$0xff]  ;;  %v684_v7 = vpack.c.bf16 %v100_v3, %v99_v2  ;;  %v101_v9 = vld [vmem:[%s1116_s1 + $0x240] sm:$0xff]  ;;  %v119_v11 = vld [vmem:[%s1116_s1 + $0x2d0] sm:$0xff] }
  0x2b   :  { %603 = vmatprep.mubr.msk.f32.mxu1 %vm134_vm0, %v21_v63  ;;  %v686_v8 = vpack.c.bf16 %v118_v6, %v117_v5  ;;  %v102_v10 = vld [vmem:[%s1116_s1 + $0x248] sm:$0xff]  ;;  %v120_v12 = vld [vmem:[%s1116_s1 + $0x2d8] sm:$0xff]  ;;  %v103_v15 = vld [vmem:[%s1116_s1 + $0x250] sm:$0xff] }
  0x2c   :  { %v688_v13 = vpack.c.bf16 %v102_v10, %v101_v9  ;;  %v690_v14 = vpack.c.bf16 %v120_v12, %v119_v11  ;;  %v104_v16 = vld [vmem:[%s1116_s1 + $0x258] sm:$0xff]  ;;  %v121_v17 = vld [vmem:[%s1116_s1 + $0x2e0] sm:$0xff]  ;;  %v122_v18 = vld [vmem:[%s1116_s1 + $0x2e8] sm:$0xff] }
  0x2d   :  { %681 = vmatpush3.bf16.msra.mxu0 %v680_v0  ;;  %v692_v19 = vpack.c.bf16 %v104_v16, %v103_v15  ;;  %v694_v20 = vpack.c.bf16 %v122_v18, %v121_v17  ;;  %v105_v21 = vld [vmem:[%s1116_s1 + $0x260] sm:$0xff]  ;;  %v106_v22 = vld [vmem:[%s1116_s1 + $0x268] sm:$0xff]  ;;  %v123_v23 = vld [vmem:[%s1116_s1 + $0x2f0] sm:$0xff] }
  0x2e   :  { %604 = vmatmul.mubr.msk.f32.vlgmr.msra.gmra.mrb[4].mxu1 %vm134_vm0, %v28_v4  ;;  %683 = vmatprep.subr.bf16.mxu0 %v682_v1  ;;  %v124_v24 = vld [vmem:[%s1116_s1 + $0x2f8] sm:$0xff]  ;;  %v696_v25 = vpack.c.bf16 %v106_v22, %v105_v21  ;;  %v107_v27 = vld [vmem:[%s1116_s1 + $0x270] sm:$0xff]  ;;  %v19_v30 = vld [vmem:[%s1115_s0 + $0x20] sm:$0xff] }
  0x2f   :  { %v698_v26 = vpack.c.bf16 %v124_v24, %v123_v23  ;;  %v108_v28 = vld [vmem:[%s1116_s1 + $0x278] sm:$0xff]  ;;  %v27_v31 = vld [vmem:[%s1115_s0 + $0x60] sm:$0xff] }
  0x30   :  { %v700_v29 = vpack.c.bf16 %v108_v28, %v107_v27  ;;  %v26_v32 = vld [vmem:[%s1115_s0 + $0x58] sm:$0xff]  ;;  %v478_v34 = vld [vmem:[%s1117_s2] ss:$0 sm:$0xff]  ;;  %s741_s0 = smov [#allocation2]  }
  0x31   :  { %685 = vmatpush3.bf16.msra.mxu0 %v684_v7  ;;  %s467_s2 = sshll.u32 %s741_s0, 4  ;;  %s468_s2 = int_to_ptr.vmem [resolvable:$true] %s467_s2 }
  0x32   :  { %687 = vmatprep.subr.bf16.mxu0 %v686_v8  ;;  %s717_s21 = scalar_lea.vmem %s468_s2, 256  ;;  %p722_p1 = scmp.lt.s32.totalorder %s468_s2, %s468_s2 }
  0x33   :  { %p718_p0 = scmp.ne.s32.totalorder %s468_s2, %s717_s21  ;;  %p723_p2 = scmp.lt.s32.totalorder %s717_s21, %s717_s21 }
  0x35   :  { %689 = vmatpush3.bf16.msra.mxu0 %v688_v13  ;;  %p724_p3 = por %p723_p2, %p722_p1 }
  0x36   :  { %691 = vmatprep.subr.bf16.mxu0 %v690_v14 }
  0x37   :  { %p725_p4 = pnand %p724_p3, %p718_p0 }
  0x39   :  { %693 = vmatpush3.bf16.msra.mxu0 %v692_v19 }
  0x3a   :  { %695 = vmatprep.subr.bf16.mxu0 %v694_v20 }
  0x3d   :  { %697 = vmatpush3.bf16.msra.mxu0 %v696_v25 }
  0x3e   :  { %699 = vmatprep.subr.bf16.mxu0 %v698_v26 }
  0x41   :  { %701 = vmatpush3.bf16.msra.mxu0 %v700_v29 }
  0x44   :  { %356 = vmatmul.mubr.f32.vlgmr.msra.gmra.mrb[4].mxu0 %v19_v30 }
  0x45   :  { %360 = vmatprep.mubr.f32.mxu0 %v27_v31 }
  0x48   :  { %361 = vmatmul.mubr.f32.gmra.mrb[6].mxu0 %v26_v32 }
  0xf7   :  { %v513_v33 = vpop.f32.mrb[0].mxu0 }
  0xf8   :  { %v514_v35 = vpop.f32.mrb[1].mxu0 }
  0xf9   :  { %v551_v36 = vpop.f32.mrb[0].mxu1  ;;  %v515_v37 = vadd.f32 %v514_v35, %v513_v33 }
  0xfa   :  { %v552_v38 = vpop.f32.mrb[1].mxu1 }
  0xfb   :  { %v553_v39 = vadd.f32 %v552_v38, %v551_v36  ;;  %v208_v40 = vadd.f32 %v515_v37, %v478_v34  ;;  %v516_v41 = vpop.f32.mrb[2].mxu0 }
  0xfc   :  { %v517_v42 = vpop.f32.mrb[3].mxu0 }
  0xfd   :  { %v554_v43 = vpop.f32.mrb[2].mxu1  ;;  %v283_v44 = vadd.f32 %v553_v39, %v208_v40  ;;  %v518_v45 = vadd.f32 %v517_v42, %v516_v41 }
  0xfe   :  { %v555_v46 = vpop.f32.mrb[3].mxu1 }
  0xff   :  { %v556_v47 = vadd.f32 %v555_v46, %v554_v43  ;;  %v213_v48 = vadd.f32 %v518_v45, %v478_v34 }
 0x101   :  { %v605_v49 = vpop.f32.mrb[4].mxu1  ;;  %v288_v50 = vadd.f32 %v556_v47, %v213_v48 }
 0x102   :  { %v432_v51 = vpop.f32.mrb[5].mxu1 }
 0x117   :  { %v589_v52 = vpop.f32.mrb[4].mxu0 }
 0x118   :  { %v590_v53 = vpop.f32.mrb[5].mxu0 }
 0x119   :  { %v591_v54 = vadd.f32 %v590_v53, %v589_v52 }
 0x11b   :  { %v592_v55 = vpop.f32.mrb[6].mxu0  ;;  %v358_v56 = vadd.f32 %v591_v54, %v283_v44 }
 0x11c   :  { %v593_v57 = vpop.f32.mrb[7].mxu0 }
 0x11d   :  { %v433_v58 = vadd.f32 %v432_v51, %v358_v56  ;;  %v594_v59 = vadd.f32 %v593_v57, %v592_v55 }
 0x11f   :  { %v363_v60 = vadd.f32 %v594_v59, %v288_v50  ;;  %441 = vmax.xlane.f32.xlu0 %v433_v58 }
 0x121   :  { %v438_v61 = vadd.f32 %v605_v49, %v363_v60 }
 0x123   :  { %443 = vmax.xlane.f32.xlu0 %v438_v61 }
 0x1ac   :  { %v442_v62 = vpop.xlane.xlu0 %441 }
 0x1ad   :  { %v445_v63 = vsub.f32 %v433_v58, %v442_v62 }
 0x1af   :  { %v447_v0 = vmul.f32 1.442695, %v445_v63 }
 0x1b0   :  { %v444_v1 = vpop.xlane.xlu0 %443 }
 0x1b1   :  { %709 = vpow2.f32 %v447_v0  ;;  %v446_v2 = vsub.f32 %v438_v61, %v444_v1 }
 0x1b3   :  { %v449_v3 = vmul.f32 1.442695, %v446_v2 }
 0x1b5   :  { %711 = vpow2.f32 %v449_v3 }
 0x1bb   :  { %v710_v4 = vpop.eup %709 }
 0x1bc   :  { %451 = vadd.xlane.f32.xlu1 %v710_v4 }
 0x1bf   :  { %v712_v5 = vpop.eup %711 }
 0x1c0   :  { %453 = vadd.xlane.f32.xlu1 %v712_v5 }
 0x249   :  { %v452_v6 = vpop.xlane.xlu1 %451 }
 0x24a   :  { %713 = vrcp.f32 %v452_v6 }
 0x24d   :  { %v454_v7 = vpop.xlane.xlu1 %453 }
 0x24e   :  { %715 = vrcp.f32 %v454_v7 }
 0x254   :  { %v714_v8 = vpop.eup %713 }
 0x255   :  { %v457_v9 = vmul.f32 %v714_v8, %v710_v4 }
 0x257   :  { %460 = vst.msk [vmem:[#allocation2] sm:$0xff] %vm459_vm1, %v457_v9 }
 0x258   :  { %v716_v10 = vpop.eup %715 }
 0x259   :  { %v458_v11 = vmul.f32 %v716_v10, %v712_v5 }
 0x25b   :  { %461 = vst.msk [vmem:[#allocation2 + $0x8] sm:$0xff] %vm459_vm1, %v458_v11 }
 0x25c   :  { %728 = shalt.err (!%p725_p4)
}
 0x25d   :  { %s729_s24 = scalar_lea.hbm %s1118_s3, 256 }
 0x25e   :  { %p730_p5 = scmp.ne.s32.totalorder %s1118_s3, %s729_s24  ;;  %p733_p6 = scmp.lt.u32.totalorder %s729_s24, %s1118_s3 }
 0x260   :  { %p735_p7 = pnand %p733_p6, %p730_p5 }
 0x262   :  { %738 = shalt.err (!%p735_p7)
}
 0x263   :  { %s742_s29 = smov 128   ;;  %s743_s30 = smov 8  }
 0x264   :  { %473 = dma.vmem_to_hbm [thread:$0]  %s468_s2, 256, %s1118_s3, [#allocation3], %s742_s29, %s742_s29, %s743_s30  }
 0x265   :  { %739 = dma.done.wait [#allocation3], 256  }
 0x266   :  { %740 = vsyncadd [#allocation3], 4294967040 }
 0x267   :  { %477 = vsyncpa [#allocation3], 1 }

</bundles_post_ra>
